<compile_context>
chip_gen: v6e
topology: v6e:2x2x1
jax: 0.10.0
libtpu: 0.0.40
codegen_flags: <defaults>
</compile_context>

<pallas_src>
import functools
import math

import jax
import jax.numpy as jnp
from jax import lax
from jax.experimental import pallas as pl
from jax.experimental.pallas import tpu as pltpu


_LANES = 512                    # lane-dense minor dim (multiple of 128)
_TILE_BYTES = 4 * 1024 * 1024   # ~4 MiB per tile buffer (per stream)
_VMEM_LIMIT = 48 * 1024 * 1024  # explicit scoped VMEM: > v5e's 16 MiB default,
                                # < v7x's 64 MiB physical (GLU worst case:
                                # 3 streams x 2 buffers x <=4 MiB = 24 MiB)

_SUPPORTED = {
    "relu", "relu6", "leakyrelu", "prelu", "celu", "elu", "hardswish",
    "hardtanh", "gelu", "glu", "selu", "silu", "sigmoid", "softmax",
    "tanh", "none",
}
_TRANSCENDENTAL = {"celu", "elu", "gelu", "selu", "silu", "sigmoid", "tanh"}


def _sublane(dtype):
    """Minimum sublane multiple for a dtype (8 for f32, 16 for bf16, ...)."""
    return max(8, 32 // jnp.dtype(dtype).itemsize)


# ---------------------------------------------------------------------------
# Elementwise activation math (runs inside the kernel body)
# ---------------------------------------------------------------------------
def _apply_elementwise(act_type, x, **kw):
    if act_type == "relu":
        return jnp.maximum(x, 0.0)
    if act_type == "relu6":
        return jnp.clip(x, 0.0, 6.0)
    if act_type == "leakyrelu":
        slope = kw.get("negative_slope", 0.01)
        return jnp.where(x >= 0, x, slope * x)
    if act_type == "prelu":
        # nn.PReLU() default: num_parameters=1, init=0.25 -> compile-time const.
        # TODO(synk): plumb trained per-channel PReLU weights when available.
        slope = float(kw.get("init", 0.25))
        return jnp.where(x >= 0, x, slope * x)
    if act_type == "celu":
        alpha = kw.get("alpha", 1.0)
        inv_alpha = 1.0 / alpha  # trace-time constant: multiply, not divide
        return jnp.maximum(x, 0.0) + jnp.minimum(
            0.0, alpha * (jnp.exp(x * inv_alpha) - 1.0)
        )
    if act_type == "elu":
        alpha = kw.get("alpha", 1.0)
        return jnp.where(x > 0, x, alpha * (jnp.exp(x) - 1.0))
    if act_type == "hardswish":
        return x * jnp.clip(x + 3.0, 0.0, 6.0) * (1.0 / 6.0)
    if act_type == "hardtanh":
        lo = kw.get("min_val", -1.0)
        hi = kw.get("max_val", 1.0)
        return jnp.clip(x, lo, hi)
    if act_type == "gelu":
        # PyTorch default GELU is the exact erf formulation.
        return 0.5 * x * (1.0 + lax.erf(x * (1.0 / math.sqrt(2.0))))
    if act_type == "selu":
        alpha = 1.6732632423543772
        scale = 1.0507009873554805
        return scale * (
            jnp.maximum(x, 0.0) + jnp.minimum(0.0, alpha * (jnp.exp(x) - 1.0))
        )
    if act_type == "silu":
        return x * (1.0 / (1.0 + jnp.exp(-x)))
    if act_type == "sigmoid":
        return 1.0 / (1.0 + jnp.exp(-x))
    if act_type == "tanh":
        return jnp.tanh(x)
    raise NotImplementedError(f"Unsupport activation type: {act_type}")


# ---------------------------------------------------------------------------
# Kernels
# ---------------------------------------------------------------------------
def _elementwise_kernel(x_ref, o_ref, *, act_type, kw):
    o_ref[...] = _apply_elementwise(act_type, x_ref[...], **kw).astype(o_ref.dtype)


def _glu_kernel_3d(x_ref, o_ref, *, half):
    # Block covers the full gated dimension; slice the halves in-register.
    x = x_ref[...]
    a = x[:, :half, :]
    g = x[:, half:, :].astype(jnp.float32)
    o_ref[...] = (a * (1.0 / (1.0 + jnp.exp(-g)))).astype(o_ref.dtype)


def _glu_kernel_2d(x_ref, o_ref, *, half):
    # Gated dimension is the trailing (lane) axis.
    x = x_ref[...]
    a = x[:, :half]
    g = x[:, half:].astype(jnp.float32)
    o_ref[...] = (a * (1.0 / (1.0 + jnp.exp(-g)))).astype(o_ref.dtype)


def _softmax_kernel(x_ref, o_ref):
    # Block (1, C, TILE_S): reduction over C stays off the lane axis.
    x = x_ref[...].astype(jnp.float32)
    m = jnp.max(x, axis=1, keepdims=True)
    e = jnp.exp(x - m)
    s = jnp.sum(e, axis=1, keepdims=True)
    o_ref[...] = (e * pl.reciprocal(s)).astype(o_ref.dtype)


def _softmax_lane_kernel(x_ref, o_ref):
    # (B, C) style softmax: the reduced dim lives on the lane axis.
    x = x_ref[...].astype(jnp.float32)
    m = jnp.max(x, axis=-1, keepdims=True)
    e = jnp.exp(x - m)
    s = jnp.sum(e, axis=-1, keepdims=True)
    o_ref[...] = (e * pl.reciprocal(s)).astype(o_ref.dtype)


# ---------------------------------------------------------------------------
# Elementwise wrapper
# ---------------------------------------------------------------------------
def _elementwise_forward(x, act_type, kw):
    shape = x.shape
    dtype = x.dtype
    itemsize = jnp.dtype(dtype).itemsize
    total = x.size
    sub = _sublane(dtype)

    padded = (total % _LANES) != 0
    rows = -(-total // _LANES)
    if padded:
        # TODO(synk): this pad is one extra HBM pass; only non-lane-divisible
        # shapes take it -- typical BiSeNetv2 feature maps go straight through.
        flat = jnp.pad(x.reshape(-1), (0, rows * _LANES - total))
        x2d = flat.reshape(rows, _LANES)
    else:
        x2d = x.reshape(rows, _LANES)  # free reshape, no copy

    # dtype-aware tile: keep ~_TILE_BYTES per buffer, sublane-aligned.
    tile_rows = max(sub, (_TILE_BYTES // (_LANES * itemsize)) // sub * sub)
    if rows <= tile_rows:
        tile_rows = rows               # single block == full array dims
        grid = (1,)
    else:
        grid = (pl.cdiv(rows, tile_rows),)   # boundary block is masked

    spec = pl.BlockSpec((tile_rows, _LANES), lambda i: (i, 0))
    n = rows * _LANES
    cost = pl.CostEstimate(
        flops=4 * n,
        transcendentals=n if act_type in _TRANSCENDENTAL else 0,
        bytes_accessed=2 * n * itemsize,
    )
    kern = functools.partial(_elementwise_kernel, act_type=act_type, kw=kw)
    y2d = pl.pallas_call(
        kern,
        out_shape=jax.ShapeDtypeStruct((rows, _LANES), dtype),
        grid=grid,
        in_specs=[spec],
        out_specs=spec,
        compiler_params=pltpu.CompilerParams(
            dimension_semantics=("parallel",),
            vmem_limit_bytes=_VMEM_LIMIT),
        cost_estimate=cost,
    )(x2d)
    if padded:
        return y2d.reshape(-1)[:total].reshape(shape)
    return y2d.reshape(shape)


# ---------------------------------------------------------------------------
# Softmax wrapper
# ---------------------------------------------------------------------------
def _softmax_forward(x, axis):
    axis = axis % x.ndim
    shape = x.shape
    dtype = x.dtype
    itemsize = jnp.dtype(dtype).itemsize
    b = math.prod(shape[:axis]) if axis > 0 else 1
    c = shape[axis]
    s = math.prod(shape[axis + 1:]) if axis + 1 < x.ndim else 1
    n = b * c * s

    if s == 1:
        # (B, C) style: lay C on the lane axis, reduce across lanes -- no
        # 128x padding waste for fully-connected-style softmax calls.
        x2 = x.reshape(b, c)
        sub = _sublane(dtype)
        tile_b = max(sub, (_TILE_BYTES // max(1, c * itemsize)) // sub * sub)
        if b <= tile_b:
            tile_b = b
            grid = (1,)
        else:
            grid = (pl.cdiv(b, tile_b),)
        spec = pl.BlockSpec((tile_b, c), lambda i: (i, 0))
        cost = pl.CostEstimate(flops=4 * n, transcendentals=n,
                               bytes_accessed=2 * n * itemsize)
        y2 = pl.pallas_call(
            _softmax_lane_kernel,
            out_shape=jax.ShapeDtypeStruct((b, c), dtype),
            grid=grid,
            in_specs=[spec],
            out_specs=spec,
            compiler_params=pltpu.CompilerParams(
                dimension_semantics=("parallel",),
                vmem_limit_bytes=_VMEM_LIMIT),
            cost_estimate=cost,
        )(x2)
        return y2.reshape(shape)

    x3 = x.reshape(b, c, s)
    # Lane tile: multiple of 128 sized so one block is ~_TILE_BYTES (big lane
    # tiles when C is small).  No spatial padding -- boundary block is masked.
    tile_s = _TILE_BYTES // max(1, c * itemsize)
    tile_s = max(128, (tile_s // 128) * 128)
    if tile_s >= s:
        tile_s = s
    grid = (b, pl.cdiv(s, tile_s))
    spec = pl.BlockSpec((1, c, tile_s), lambda bi, si: (bi, 0, si))
    cost = pl.CostEstimate(flops=4 * n, transcendentals=n,
                           bytes_accessed=2 * n * itemsize)
    y3 = pl.pallas_call(
        _softmax_kernel,
        out_shape=jax.ShapeDtypeStruct((b, c, s), dtype),
        grid=grid,
        in_specs=[spec],
        out_specs=spec,
        compiler_params=pltpu.CompilerParams(
            dimension_semantics=("parallel", "parallel"),
            vmem_limit_bytes=_VMEM_LIMIT),
        cost_estimate=cost,
    )(x3)
    return y3.reshape(shape)


# ---------------------------------------------------------------------------
# GLU wrapper -- single streaming pass over the original tensor
# ---------------------------------------------------------------------------
def _glu_forward(x, axis):
    axis = axis % x.ndim
    g = x.shape[axis]
    if g % 2 != 0:
        raise ValueError("GLU requires an even size along the gated dimension")
    half = g // 2
    shape = x.shape
    dtype = x.dtype
    itemsize = jnp.dtype(dtype).itemsize
    b = math.prod(shape[:axis]) if axis > 0 else 1
    s = math.prod(shape[axis + 1:]) if axis + 1 < x.ndim else 1
    out_shape = shape[:axis] + (half,) + shape[axis + 1:]
    n_out = b * half * s
    cost = pl.CostEstimate(
        flops=4 * n_out, transcendentals=n_out,
        bytes_accessed=(b * g * s + n_out) * itemsize)
    cparams = pltpu.CompilerParams(
        dimension_semantics=("parallel",) if s == 1 else ("parallel", "parallel"),
        vmem_limit_bytes=_VMEM_LIMIT)

    if s == 1:
        # Gated dim is trailing: halves are lane slices of a (B, G) slab.
        x2 = x.reshape(b, g)
        sub = _sublane(dtype)
        tile_b = max(sub, (_TILE_BYTES // max(1, g * itemsize)) // sub * sub)
        if b <= tile_b:
            tile_b = b
            grid = (1,)
        else:
            grid = (pl.cdiv(b, tile_b),)
        y2 = pl.pallas_call(
            functools.partial(_glu_kernel_2d, half=half),
            out_shape=jax.ShapeDtypeStruct((b, half), dtype),
            grid=grid,
            in_specs=[pl.BlockSpec((tile_b, g), lambda i: (i, 0))],
            out_specs=pl.BlockSpec((tile_b, half), lambda i: (i, 0)),
            compiler_params=cparams,
            cost_estimate=cost,
        )(x2)
        return y2.reshape(out_shape)

    # General case: (B, G, S) blocks covering the full gated dim; halves are
    # sliced in-kernel, so x is read from HBM exactly once (no slice/repack).
    x3 = x.reshape(b, g, s)
    tile_s = s if s <= 512 else 512
    tile_b = max(1, _TILE_BYTES // max(1, g * tile_s * itemsize))
    tile_b = min(tile_b, b)
    grid = (pl.cdiv(b, tile_b), pl.cdiv(s, tile_s))
    y3 = pl.pallas_call(
        functools.partial(_glu_kernel_3d, half=half),
        out_shape=jax.ShapeDtypeStruct((b, half, s), dtype),
        grid=grid,
        in_specs=[pl.BlockSpec((tile_b, g, tile_s), lambda bi, si: (bi, 0, si))],
        out_specs=pl.BlockSpec((tile_b, half, tile_s), lambda bi, si: (bi, 0, si)),
        compiler_params=cparams,
        cost_estimate=cost,
    )(x3)
    return y3.reshape(out_shape)


# ---------------------------------------------------------------------------
# Wrapper: equivalent of Activation(act_type, **kwargs).forward(x)
# ---------------------------------------------------------------------------
def activation_forward(x, act_type, **kwargs):
    act_type = act_type.lower()
    if act_type not in _SUPPORTED:
        raise NotImplementedError(f"Unsupport activation type: {act_type}")

    if act_type == "none":
        return x  # nn.Identity

    if act_type == "softmax":
        return _softmax_forward(x, kwargs.get("dim", 1))

    if act_type == "glu":
        return _glu_forward(x, kwargs.get("dim", -1))

    # TODO(synk): standalone activations are a full HBM read+write of the
    # feature map; fusing them into the producing conv/BN kernels is the
    # bigger win once those are Pallas kernels too.
    return _elementwise_forward(x, act_type, kwargs)


# ---------------------------------------------------------------------------
# Demo / self-check
# ---------------------------------------------------------------------------
if __name__ == "__main__":
    key = jax.random.PRNGKey(0)
    k1, k2, k3, k4 = jax.random.split(key, 4)
    x = jax.random.normal(k1, (2, 4, 16, 16), dtype=jnp.float32)  # NCHW

    checks = []

    y = activation_forward(x, "relu")
    checks.append((y, jnp.maximum(x, 0.0)))

    y = activation_forward(x, "relu6")
    checks.append((y, jnp.clip(x, 0.0, 6.0)))

    y = activation_forward(x, "leakyrelu")
    checks.append((y, jnp.where(x >= 0, x, 0.01 * x)))

    y = activation_forward(x, "gelu")
    checks.append((y, jax.nn.gelu(x, approximate=False)))

    y = activation_forward(x, "silu")
    checks.append((y, jax.nn.silu(x)))

    y = activation_forward(x, "hardswish")
    checks.append((y, jax.nn.hard_swish(x)))

    y = activation_forward(x, "tanh")
    checks.append((y, jnp.tanh(x)))

    y = activation_forward(x, "sigmoid")
    checks.append((y, jax.nn.sigmoid(x)))

    y = activation_forward(x, "prelu")
    checks.append((y, jnp.where(x >= 0, x, 0.25 * x)))

    y = activation_forward(x, "softmax", dim=1)
    checks.append((y, jax.nn.softmax(x, axis=1)))

    y = activation_forward(x, "glu", dim=1)
    a, b = jnp.split(x, 2, axis=1)
    checks.append((y, a * jax.nn.sigmoid(b)))

    y = activation_forward(x, "none")
    checks.append((y, x))

    # non-lane-divisible shape exercises the pad fallback
    x_odd = jax.random.normal(k2, (2, 3, 7, 5), dtype=jnp.float32)
    y = activation_forward(x_odd, "relu")
    checks.append((y, jnp.maximum(x_odd, 0.0)))

    # bf16 path (dtype-aware sublane/tile sizing)
    x_bf = jax.random.normal(k3, (2, 8, 32, 32), dtype=jnp.float32).astype(jnp.bfloat16)
    y = activation_forward(x_bf, "relu")
    checks.append((y, jnp.maximum(x_bf, jnp.bfloat16(0))))

    # (B, C) softmax exercises the lane-reduction special case (s == 1)
    x_fc = jax.random.normal(k4, (16, 11), dtype=jnp.float32)
    y = activation_forward(x_fc, "softmax", dim=1)
    checks.append((y, jax.nn.softmax(x_fc, axis=1)))

    for got, ref in checks:
        got = jax.block_until_ready(got)
        assert got.shape == ref.shape and got.dtype == ref.dtype
        assert jnp.allclose(got.astype(jnp.float32), ref.astype(jnp.float32),
                            atol=1e-5, rtol=1e-5), "mismatch"

    print("KERNEL_OK")
</pallas_src>

<mosaic_0001>
module attributes {stable_mosaic.version = 11 : i64} {
  func.func @_elementwise_kernel(%arg0: i32, %arg1: memref<4x512xf32, #tpu.memory_space<vmem>>, %arg2: memref<4x512xf32, #tpu.memory_space<vmem>>) attributes {dimension_semantics = [#tpu.dimension_semantics<parallel>], iteration_bounds = array<i64: 1>, scalar_prefetch = 0 : i64, scratch_operands = 0 : i64, tpu.core_type = #tpu.core_type<tc>, window_params = [{transform_indices = @transform_0, window_bounds = array<i64: 4, 512>}, {transform_indices = @transform_1, window_bounds = array<i64: 4, 512>}]} {
    %c0 = arith.constant 0 : index
    %c0_0 = arith.constant 0 : index
    %0 = vector.load %arg1[%c0, %c0_0] : memref<4x512xf32, #tpu.memory_space<vmem>>, vector<4x512xf32>
    %cst = arith.constant 0.000000e+00 : f32
    %1 = vector.broadcast %cst : f32 to vector<4x512xf32>
    %2 = arith.maximumf %0, %1 : vector<4x512xf32>
    %c0_1 = arith.constant 0 : index
    %c0_2 = arith.constant 0 : index
    %3 = vector.load %arg2[%c0_1, %c0_2] : memref<4x512xf32, #tpu.memory_space<vmem>>, vector<4x512xf32>
    tpu.vector_store %arg2[%c0_1, %c0_2], %2 {strides = array<i32>} : memref<4x512xf32, #tpu.memory_space<vmem>>, vector<4x512xf32>,
    return
  }
  func.func @transform_0(%arg0: i32) -> (i32, i32) {
    %c0_i32 = arith.constant 0 : i32
    %c0_i32_0 = arith.constant 0 : i32
    return %arg0, %c0_i32 : i32, i32
  }
  func.func @transform_1(%arg0: i32) -> (i32, i32) {
    %c0_i32 = arith.constant 0 : i32
    %c0_i32_0 = arith.constant 0 : i32
    return %arg0, %c0_i32 : i32, i32
  }
}

</mosaic_0001>

<bundles_post_ra>
// kernel: tpu_custom_call.1
= control target key start
LH: loop header
LB: loop body
LE: loop exit
PB: predicated region body
PF: predicated region fallthrough
CT: control target
= control target key end

     0   :  { %6 = vsyncpa [#allocation3], 0  ;;  %s106_s0 = inlined_call_operand.hbm [shape: f32[4,512], index: 0, kind: input, shape index: {}]   ;;  %s107_s1 = inlined_call_operand.hbm [shape: f32[4,512], index: 1, kind: output, shape index: {}]  }
   0x1   :  { %7 = vsyncpa [#allocation4], 0  ;;  %s88_s6 = smov [#allocation2]  }
   0x2   :  { %s14_s7 = sshll.u32 %s88_s6, 4  ;;  %s15_s7 = int_to_ptr.vmem [resolvable:$true] %s14_s7 }
   0x3   :  { %s52_s8 = scalar_lea.vmem %s15_s7, 256  ;;  %p57_p1 = scmp.lt.s32.totalorder %s15_s7, %s15_s7 }
   0x4   :  { %p53_p0 = scmp.ne.s32.totalorder %s15_s7, %s52_s8  ;;  %p58_p2 = scmp.lt.s32.totalorder %s52_s8, %s52_s8 }
   0x6   :  { %p59_p3 = por %p58_p2, %p57_p1 }
   0x8   :  { %p60_p4 = pnand %p59_p3, %p53_p0 }
   0xa   :  { %63 = shalt.err (!%p60_p4)
}
   0xb   :  { %17 = dma.hbm_to_vmem [thread:$0]  %s106_s0, 256, %s15_s7, [#allocation3]  }
   0xc   :  { %84 = dma.done.wait [#allocation3], 256  }
   0xd   :  { %85 = vsyncadd [#allocation3], 4294967040  ;;  %s89_s11 = smov [#allocation5]   ;;  %v21_v0 = vld [vmem:[#allocation2] sm:$0xff]  ;;  %v22_v1 = vld [vmem:[#allocation2 + $0x8] sm:$0xff] }
   0xe   :  { %s33_s12 = sshll.u32 %s89_s11, 4  ;;  %v23_v2 = vmax.f32 %v21_v0, 0.0  ;;  %v24_v3 = vmax.f32 %v22_v1, 0.0  ;;  %s34_s12 = int_to_ptr.vmem [resolvable:$true] %s33_s12 }
   0xf   :  { %s64_s13 = scalar_lea.vmem %s34_s12, 256  ;;  %p69_p6 = scmp.lt.s32.totalorder %s34_s12, %s34_s12 }
  0x10   :  { %25 = vst [vmem:[#allocation5] sm:$0xff] %v23_v2  ;;  %26 = vst [vmem:[#allocation5 + $0x8] sm:$0xff] %v24_v3  ;;  %p65_p5 = scmp.ne.s32.totalorder %s34_s12, %s64_s13  ;;  %p70_p7 = scmp.lt.s32.totalorder %s64_s13, %s64_s13 }
  0x12   :  { %p71_p8 = por %p70_p7, %p69_p6 }
  0x14   :  { %p72_p9 = pnand %p71_p8, %p65_p5 }
  0x16   :  { %75 = shalt.err (!%p72_p9)
}
  0x17   :  { %36 = dma.vmem_to_hbm [thread:$0]  %s34_s12, 256, %s107_s1, [#allocation4]  }
  0x18   :  { %86 = dma.done.wait [#allocation4], 256  }
  0x19   :  { %87 = vsyncadd [#allocation4], 4294967040 }
  0x1a   :  { %40 = vsyncpa [#allocation3], 1 }
  0x1b   :  { %41 = vsyncpa [#allocation4], 1 }

</bundles_post_ra>
